<compile_context>
chip_gen: v6e
topology: v6e:2x2x1
jax: 0.10.0
libtpu: 0.0.40
codegen_flags: <defaults>
</compile_context>

<pallas_src>
import functools

import jax
import jax.numpy as jnp
from jax.experimental import pallas as pl
from jax.experimental.pallas import tpu as pltpu

GAMMA = 2.5  # matches the PyTorch module default


def _focal_loss_kernel(logits_ref, target_ref, out_ref, *, n_total):
    """One (TILE_N, C) row-tile -> per-tile partial loss sum written to out_ref[0, 0, 0]."""
    i = pl.program_id(0)
    tile_n = logits_ref.shape[0]

    x = logits_ref[...].astype(jnp.float32)                 # (TILE_N, C)

    # Numerically stable logsumexp along classes — the only full-tile transcendental left.
    m = jnp.max(x, axis=-1, keepdims=True)                  # (TILE_N, 1)
    shifted = x - m
    lse = jnp.log(jnp.sum(jnp.exp(shifted), axis=-1, keepdims=True))  # (TILE_N, 1)

    # Gather the target (shifted) logit BEFORE the focal math; everything below is (TILE_N, 1).
    tgt = target_ref[...]                                    # (TILE_N, 1) int32
    col = jax.lax.broadcasted_iota(jnp.int32, shifted.shape, 1)
    picked = jnp.sum(jnp.where(col == tgt, shifted, 0.0), axis=-1, keepdims=True)

    log_p_t = picked - lse                                   # log prob of target class, <= 0
    p_t = jnp.exp(log_p_t)
    t = jnp.maximum(1.0 - p_t, 0.0)                          # clamp guards sqrt from rounding
    focal_t = (t * t) * jnp.sqrt(t)                          # t ** 2.5 without fractional pow
    per_row = -(focal_t * log_p_t)                           # (TILE_N, 1)

    # Mask rows past the true batch size (last partial tile sees padded / undefined rows).
    row = jax.lax.broadcasted_iota(jnp.int32, per_row.shape, 0) + i * tile_n
    per_row = jnp.where(row < n_total, per_row, 0.0)

    partial = jnp.sum(per_row)

    # Lane-dense (1, 8, 128) output block: partial sum at [0, 0, 0], zeros elsewhere.
    sub = jax.lax.broadcasted_iota(jnp.int32, out_ref.shape, 1)
    lane = jax.lax.broadcasted_iota(jnp.int32, out_ref.shape, 2)
    out_ref[...] = jnp.where((sub == 0) & (lane == 0), partial, 0.0)


def _choose_tile_n(n, c, itemsize):
    # Keep one logits tile under ~8 MiB so double-buffering fits every generation's scoped VMEM
    # (v7x has only 64 MiB physical / 32 MiB default scoped).
    budget_rows = max(8, (8 * 1024 * 1024) // max(1, c * itemsize))
    tile = min(1024, budget_rows)
    tile = max(8, (tile // 8) * 8)
    n_pad = ((n + 7) // 8) * 8
    return min(tile, n_pad)


def focal_loss(logits, targets, *, tile_n=None):
    """logits: (N, C) float (f32 or bf16), targets: (N,) int. Returns scalar f32 mean loss."""
    n, c = logits.shape
    targets_2d = targets.astype(jnp.int32).reshape(n, 1)

    if tile_n is None:
        tile_n = _choose_tile_n(n, c, jnp.dtype(logits.dtype).itemsize)
    num_tiles = pl.cdiv(n, tile_n)

    # Scoped VMEM: double-buffered tiles + f32 temporaries; capped safely below v7x's 64 MiB.
    tile_bytes_f32 = tile_n * c * 4
    vmem_limit = int(min(48 << 20, max(32 << 20, 6 * tile_bytes_f32)))

    kernel = functools.partial(_focal_loss_kernel, n_total=n)
    partials = pl.pallas_call(
        kernel,
        out_shape=jax.ShapeDtypeStruct((num_tiles, 8, 128), jnp.float32),
        grid_spec=pltpu.PrefetchScalarGridSpec(
            num_scalar_prefetch=0,
            grid=(num_tiles,),
            in_specs=[
                pl.BlockSpec((tile_n, c), lambda i: (i, 0)),
                pl.BlockSpec((tile_n, 1), lambda i: (i, 0)),
            ],
            out_specs=pl.BlockSpec((1, 8, 128), lambda i: (i, 0, 0)),
        ),
        compiler_params=pltpu.CompilerParams(
            dimension_semantics=("parallel",),
            vmem_limit_bytes=vmem_limit,
        ),
    )(logits, targets_2d)

    # Final reduction over per-tile partial sums + mean normalization with the TRUE N.
    return jnp.sum(partials) / jnp.float32(n)


def focal_loss_ref(logits, targets):
    # Pure-JAX reference of the PyTorch forward.
    log_prob = jax.nn.log_softmax(logits.astype(jnp.float32), axis=-1)
    prob = jnp.exp(log_prob)
    focal = jnp.power(1.0 - prob, GAMMA) * log_prob
    picked = jnp.take_along_axis(focal, targets[:, None].astype(jnp.int32), axis=-1)[:, 0]
    return jnp.mean(-picked)


if __name__ == "__main__":
    key = jax.random.PRNGKey(0)
    k1, k2 = jax.random.split(key)
    # N deliberately NOT a multiple of the tile -> exercises the padded-row mask; small shapes.
    N, C = 50, 128
    logits = jax.random.normal(k1, (N, C), dtype=jnp.float32)
    targets = jax.random.randint(k2, (N,), 0, C, dtype=jnp.int32)

    loss = jax.block_until_ready(focal_loss(logits, targets, tile_n=16))  # grid of 4 tiles
    ref = jax.block_until_ready(focal_loss_ref(logits, targets))
    assert jnp.allclose(loss, ref, atol=1e-5, rtol=1e-5), (loss, ref)
    print("KERNEL_OK")
</pallas_src>

<mosaic_0001>
module attributes {stable_mosaic.version = 11 : i64} {
  func.func @_focal_loss_kernel(%arg0: i32, %arg1: memref<16x128xf32, #tpu.memory_space<vmem>>, %arg2: memref<16x1xi32, #tpu.memory_space<vmem>>, %arg3: memref<1x8x128xf32, #tpu.memory_space<vmem>>) attributes {dimension_semantics = [#tpu.dimension_semantics<parallel>], iteration_bounds = array<i64: 4>, scalar_prefetch = 0 : i64, scratch_operands = 0 : i64, tpu.core_type = #tpu.core_type<tc>, window_params = [{transform_indices = @transform_0, window_bounds = array<i64: 16, 128>}, {transform_indices = @transform_1, window_bounds = array<i64: 16, 1>}, {transform_indices = @transform_2, window_bounds = array<i64: 1, 8, 128>}]} {
    %c0 = arith.constant 0 : index
    %c0_0 = arith.constant 0 : index
    %0 = vector.load %arg1[%c0, %c0_0] : memref<16x128xf32, #tpu.memory_space<vmem>>, vector<16x128xf32>
    %cst = arith.constant dense<0xFF800000> : vector<16xf32>
    %1 = vector.multi_reduction <maximumf>, %0, %cst [1] : vector<16x128xf32> to vector<16xf32>
    %2 = vector.shape_cast %1 : vector<16xf32> to vector<16x1xf32>
    %3 = vector.broadcast %2 : vector<16x1xf32> to vector<16x128xf32>
    %4 = arith.subf %0, %3 : vector<16x128xf32>
    %5 = math.exp %4 : vector<16x128xf32>
    %cst_1 = arith.constant dense<0.000000e+00> : vector<16xf32>
    %6 = vector.multi_reduction <add>, %5, %cst_1 [1] : vector<16x128xf32> to vector<16xf32>
    %7 = vector.shape_cast %6 : vector<16xf32> to vector<16x1xf32>
    %8 = math.log %7 : vector<16x1xf32>
    %c0_2 = arith.constant 0 : index
    %c0_3 = arith.constant 0 : index
    %9 = vector.load %arg2[%c0_2, %c0_3] : memref<16x1xi32, #tpu.memory_space<vmem>>, vector<16x1xi32>
    %10 = tpu.iota {dimensions = array<i32: 1>} : vector<16x128xi32>
    %11 = vector.broadcast %9 : vector<16x1xi32> to vector<16x128xi32>
    %12 = arith.cmpi eq, %10, %11 : vector<16x128xi32>
    %cst_4 = arith.constant 0.000000e+00 : f32
    %13 = vector.broadcast %cst_4 : f32 to vector<16x128xf32>
    %14 = arith.select %12, %4, %13 : vector<16x128xi1>, vector<16x128xf32>
    %cst_5 = arith.constant dense<0.000000e+00> : vector<16xf32>
    %15 = vector.multi_reduction <add>, %14, %cst_5 [1] : vector<16x128xf32> to vector<16xf32>
    %16 = vector.shape_cast %15 : vector<16xf32> to vector<16x1xf32>
    %17 = arith.subf %16, %8 : vector<16x1xf32>
    %18 = math.exp %17 : vector<16x1xf32>
    %cst_6 = arith.constant 1.000000e+00 : f32
    %19 = vector.broadcast %cst_6 : f32 to vector<16x1xf32>
    %20 = arith.subf %19, %18 : vector<16x1xf32>
    %cst_7 = arith.constant 0.000000e+00 : f32
    %21 = vector.broadcast %cst_7 : f32 to vector<16x1xf32>
    %22 = arith.maximumf %20, %21 : vector<16x1xf32>
    %23 = arith.mulf %22, %22 : vector<16x1xf32>
    %24 = math.sqrt %22 : vector<16x1xf32>
    %25 = arith.mulf %23, %24 : vector<16x1xf32>
    %26 = arith.mulf %25, %17 : vector<16x1xf32>
    %cst_8 = arith.constant 0.000000e+00 : f32
    %27 = vector.broadcast %cst_8 : f32 to vector<16x1xf32>
    %28 = arith.subf %27, %26 : vector<16x1xf32>
    %29 = tpu.iota {dimensions = array<i32: 0>} : vector<16x1xi32>
    %c16_i32 = arith.constant 16 : i32
    %30 = arith.muli %arg0, %c16_i32 : i32
    %31 = vector.broadcast %30 : i32 to vector<16x1xi32>
    %32 = arith.addi %29, %31 : vector<16x1xi32>
    %c50_i32 = arith.constant 50 : i32
    %33 = vector.broadcast %c50_i32 : i32 to vector<16x1xi32>
    %34 = arith.cmpi slt, %32, %33 : vector<16x1xi32>
    %cst_9 = arith.constant 0.000000e+00 : f32
    %35 = vector.broadcast %cst_9 : f32 to vector<16x1xf32>
    %36 = arith.select %34, %28, %35 : vector<16x1xi1>, vector<16x1xf32>
    %37 = vector.shape_cast %36 : vector<16x1xf32> to vector<1x16x1xf32>
    %cst_10 = arith.constant dense<0.000000e+00> : vector<1xf32>
    %38 = vector.multi_reduction <add>, %37, %cst_10 [1, 2] : vector<1x16x1xf32> to vector<1xf32>
    %39 = vector.shape_cast %38 : vector<1xf32> to vector<1x1x1xf32>
    %40 = vector.extract %39[0, 0, 0] : f32 from vector<1x1x1xf32>
    %41 = tpu.iota {dimensions = array<i32: 1>} : vector<1x8x128xi32>
    %42 = tpu.iota {dimensions = array<i32: 2>} : vector<1x8x128xi32>
    %c0_i32 = arith.constant 0 : i32
    %43 = vector.broadcast %c0_i32 : i32 to vector<1x8x128xi32>
    %44 = arith.cmpi eq, %41, %43 : vector<1x8x128xi32>
    %c0_i32_11 = arith.constant 0 : i32
    %45 = vector.broadcast %c0_i32_11 : i32 to vector<1x8x128xi32>
    %46 = arith.cmpi eq, %42, %45 : vector<1x8x128xi32>
    %47 = arith.andi %44, %46 : vector<1x8x128xi1>
    %cst_12 = arith.constant 0.000000e+00 : f32
    %48 = vector.broadcast %40 : f32 to vector<1x8x128xf32>
    %49 = vector.broadcast %cst_12 : f32 to vector<1x8x128xf32>
    %50 = arith.select %47, %48, %49 : vector<1x8x128xi1>, vector<1x8x128xf32>
    %c0_13 = arith.constant 0 : index
    %c0_14 = arith.constant 0 : index
    %c0_15 = arith.constant 0 : index
    %51 = vector.load %arg3[%c0_13, %c0_14, %c0_15] : memref<1x8x128xf32, #tpu.memory_space<vmem>>, vector<1x8x128xf32>
    tpu.vector_store %arg3[%c0_13, %c0_14, %c0_15], %50 {strides = array<i32>} : memref<1x8x128xf32, #tpu.memory_space<vmem>>, vector<1x8x128xf32>,
    return
  }
  func.func @transform_0(%arg0: i32) -> (i32, i32) {
    %c0_i32 = arith.constant 0 : i32
    %c0_i32_0 = arith.constant 0 : i32
    return %arg0, %c0_i32 : i32, i32
  }
  func.func @transform_1(%arg0: i32) -> (i32, i32) {
    %c0_i32 = arith.constant 0 : i32
    %c0_i32_0 = arith.constant 0 : i32
    return %arg0, %c0_i32 : i32, i32
  }
  func.func @transform_2(%arg0: i32) -> (i32, i32, i32) {
    %c0_i32 = arith.constant 0 : i32
    %c0_i32_0 = arith.constant 0 : i32
    %c0_i32_1 = arith.constant 0 : i32
    return %arg0, %c0_i32, %c0_i32_0 : i32, i32, i32
  }
}

</mosaic_0001>

<bundles_post_ra>
// kernel: tpu_custom_call.1
= control target key start
LH: loop header
LB: loop body
LE: loop exit
PB: predicated region body
PF: predicated region fallthrough
CT: control target
= control target key end

     0   :  { %7 = vsyncpa [#allocation3], 0  ;;  %s645_s0 = inlined_call_operand.vmem [shape: f32[50,128], index: 0, kind: input, shape index: {}]   ;;  %s646_s1 = inlined_call_operand.vmem [shape: s32[50,1], index: 1, kind: input, shape index: {}]   ;;  %s647_s2 = inlined_call_operand.hbm [shape: f32[4,8,128], index: 2, kind: output, shape index: {}]  }
   0x1   :  { %9 = vsyncpa [#allocation3 + $0x1], 0  ;;  %s544_s9 = smov 0   ;;  %s546_s10 = smov 0  }
   0x2   :  { %s548_s11 = smov 0   ;;  %s550_s12 = smov 0  }
   0x3 LB: > { %s565_s13 = sadd.s32 4294967295, %s525_s12   ;;  %s391_s14 = sadd.s32 4294967294, %s525_s12   ;;  %s525_s12 = sphi %s550_s12, %s653_s12   ;;  %s521_s11 = sphi %s548_s11, %s652_s11   ;;  %s517_s10 = sphi %s546_s10, %s651_s10   ;;  %s513_s9 = sphi %s544_s9, %s650_s9  }
   0x4   : > { %s569_s15 = sadd.s32 1, %s525_s12   ;;  %s74_s16 = sadd.s32 1, %s521_s11 }
   0x5   : > { %s71_s17 = ssub.s32 %s525_s12, %s569_s15  ;;  %p84_p0 = scmp.ne.s32.totalorder %s521_s11, %s517_s10 }
   0x6   : > { %p72_p1 = scmp.eq.s32.totalorder %s71_s17, 0  ;;  %p85_p2 = scmp.eq.s32.totalorder %s565_s13, 3 }
   0x7   : > { %p90_p3 = scmp.ne.s32.totalorder %s517_s10, %s513_s9  ;;  %p91_p4 = scmp.eq.s32.totalorder %s391_s14, 3 }
   0x8   : > { %s580_s18 = scalar_select %p72_p1, %s521_s11, %s74_s16  }
   0x9   : > { %p582_p5 = por %p85_p2, %p84_p0  ;;  %p586_p6 = por %p91_p4, %p90_p3 }
   0xa   : > { %p394_p7 = scmp.ge.s32.totalorder %s525_s12, 1  ;;  %p143_p8 = scmp.lt.s32.totalorder %s525_s12, 5 }
   0xc   : > { %p144_p9 = pnand %p394_p7, %p143_p8 }
   0xd   : > { %s396_s21 = sshll.u32 (!%p144_p9), %s565_s13, 1  ;;  %s400_s29 = sshll.u32 (!%p144_p9), %s565_s13, 4 }
   0xe   : > { %147 = sbr.rel (%p144_p9) target bundleno = 602 (0x25a), region = 28  ;;  %p183_p10 = scmp.lt.s32.totalorder (!%p144_p9), %s396_s21, 6 }
   0xf   : > { %s175_s30 = sand.u32 (!%p144_p9), 1, %s517_s10   ;;  %s402_s4 = sshll.u32 (!%p144_p9), %s565_s13, 7 }
  0x10   : > { %s395_s3 = sshll.u32 (!%p144_p9), %s175_s30, 3  ;;  %s610_s16 = scalar_lea.hbm (!%p144_p9), %s647_s2, %s402_s4 }
  0x11   : > { %s177_s5 = scalar_lea.vmem (!%p144_p9), [#allocation2], %s395_s3  ;;  %s307_s17 = scalar_lea.sflag (!%p144_p9), [#allocation3], %s175_s30 }
  0x12   : > { %s320_s6 = sshll.u32 (!%p144_p9), %s177_s5, 4  ;;  %s528_s13 = smov (!%p144_p9), [#allocation2]   ;;  %s321_s6 = int_to_ptr.vmem [resolvable:$true] %s320_s6 }
  0x13   : > { %v527_v0 = vmov 0   ;;  %s655_s21 = smov (!%p183_p10, %s396_s21), 6  ;;  %v228_v11 = vlaneseq  ;;  %v280_v44 = vstv %s400_s29  ;;  %vm287_vm8 = vcmask 7168  }
  0x14   : > { %447 = vset.pattern.permute.xlu1 %v527_v0  ;;  %448 = vset.pattern.permute.xlu0 %v527_v0  ;;  %s397_s22 = sshll.u32 %s655_s21, 3  ;;  %s465_s21 = scalar_lea.vmem %s321_s6, 128 }
  0x15   : > { %s186_s25 = scalar_lea.vmem %s645_s0, %s397_s22  ;;  %s200_s28 = scalar_lea.vmem %s646_s1, %s397_s22  ;;  %v599_v13 = vand.u32 127, %v228_v11  ;;  %v277_v40 = vshrl.u32 %v228_v11, 7 }
  0x16   : > { %v206_v1 = vld [vmem:[%s186_s25] sm:$0xff]  ;;  %v207_v3 = vld [vmem:[%s186_s25 + $0x8] sm:$0xff]  ;;  %p466_p11 = scmp.ne.s32.totalorder %s321_s6, %s465_s21  ;;  %s469_s22 = sshll.u32 %s528_s13, 4  ;;  %s470_s22 = int_to_ptr.vmem [resolvable:$false] %s469_s22 }
  0x17   : > { %v226_v2 = vld [vmem:[%s200_s28] sm:$0xff]  ;;  %208 = vmax.xlane.f32.xlu0 %v206_v1  ;;  %v227_v4 = vld [vmem:[%s200_s28 + $0x8] sm:$0xff]  ;;  %v278_v47 = vadd.s32 8, %v277_v40  ;;  %v281_v51 = vadd.s32 %v280_v44, %v277_v40  ;;  %vm300_vm9 = vcmp.eq.s32.totalorder %v277_v40, 0  ;;  %vm301_vm10 = vcmp.eq.s32.totalorder %v599_v13, 0  ;;  %s471_s23 = scalar_lea.vmem %s470_s22, 256  ;;  %p472_p0 = scmp.lt.s32.totalorder %s321_s6, %s470_s22 }
  0x18   : > { %231 = vperm.xlu1 %447, %v226_v2   ;;  %vm302_vm11 = vmand %vm300_vm9, %vm301_vm10  ;;  %p467_p12 = pnand %p466_p11, %p582_p5  ;;  %p473_p1 = scmp.lt.s32.totalorder %s471_s23, %s465_s21 }
  0x19   : > { %v282_v55 = vadd.s32 %v280_v44, %v278_v47  ;;  %vm283_vm6 = vcmp.lt.s32.totalorder %v281_v51, 50 }
  0x1a   : > { %p468_p13 = pneg %p467_p12  ;;  %p474_p2 = por %p473_p1, %p472_p0 }
  0x1b   : > { %210 = vmax.xlane.f32.xlu0 %v207_v3  ;;  %vm284_vm7 = vcmp.lt.s32.totalorder %v282_v55, 50 }
  0x1c   : > { %234 = vperm.xlu1 %447, %v227_v4   ;;  %p475_p3 = pnand %p474_p2, %p468_p13 }
  0x93   : > { %v232_v12 = vpop.permute.xlu1 %231 }
  0x94   : > { %vm236_vm0 = vcmp.eq.s32.totalorder %v599_v13, %v232_v12 }
  0x97   : > { %v235_v15 = vpop.permute.xlu1 %234 }
  0x98   : > { %vm237_vm1 = vcmp.eq.s32.totalorder %v599_v13, %v235_v15 }
  0xa0   : > { %v209_v5 = vpop.xlane.xlu0 %208 }
  0xa1   : > { %v212_v6 = vsub.f32 %v206_v1, %v209_v5 }
  0xa3   : > { %v214_v7 = vmul.f32 1.442695, %v212_v6  ;;  %v238_v17 = vsel %vm236_vm0, %v212_v6, 0.0 }
  0xa4   : > { %v211_v8 = vpop.xlane.xlu0 %210 }
  0xa5   : > { %449 = vpow2.f32 %v214_v7  ;;  %v213_v9 = vsub.f32 %v207_v3, %v211_v8 }
  0xa7   : > { %v216_v10 = vmul.f32 1.442695, %v213_v9  ;;  %v239_v18 = vsel %vm237_vm1, %v213_v9, 0.0 }
  0xa9   : > { %451 = vpow2.f32 %v216_v10 }
  0xb2   : > { %v450_v14 = vpop.eup %449 }
  0xb3   : > { %218 = vadd.xlane.f32.xlu0 %v450_v14 }
  0xb6   : > { %v452_v16 = vpop.eup %451 }
  0xb7   : > { %240 = vadd.xlane.f32.xlu0 %v238_v17  ;;  %220 = vadd.xlane.f32.xlu1 %v452_v16 }
  0xbb   : > { %242 = vadd.xlane.f32.xlu0 %v239_v18 }
 0x13c   : > { %v219_v19 = vpop.xlane.xlu0 %218 }
 0x13d   : > { %453 = vlog2.f32 %v219_v19 }
 0x140   : > { %v221_v20 = vpop.xlane.xlu1 %220  ;;  %v241_v22 = vpop.xlane.xlu0 %240 }
 0x141   : > { %455 = vlog2.f32 %v221_v20 }
 0x144   : > { %v243_v28 = vpop.xlane.xlu0 %242 }
 0x14a   : > { %v454_v21 = vpop.eup %453 }
 0x14b   : > { %v223_v23 = vmul.f32 0.6931472, %v454_v21 }
 0x14d   : > { %v244_v24 = vsub.f32 %v241_v22, %v223_v23 }
 0x14e   : > { %v456_v25 = vpop.eup %455 }
 0x14f   : > { %v246_v26 = vmul.f32 1.442695, %v244_v24  ;;  %v225_v27 = vmul.f32 0.6931472, %v456_v25 }
 0x151   : > { %457 = vpow2.f32 %v246_v26  ;;  %v245_v29 = vsub.f32 %v243_v28, %v225_v27 }
 0x153   : > { %v248_v30 = vmul.f32 1.442695, %v245_v29 }
 0x155   : > { %459 = vpow2.f32 %v248_v30 }
 0x15e   : > { %v458_v31 = vpop.eup %457 }
 0x15f   : > { %v250_v32 = vsub.f32 1.0, %v458_v31 }
 0x161   : > { %v252_v33 = vmax.f32 %v250_v32, 0.0 }
 0x162   : > { %v460_v34 = vpop.eup %459 }
 0x163   : > { %461 = vrsqrt.f32 %v252_v33  ;;  %v251_v35 = vsub.f32 1.0, %v460_v34  ;;  %vm258_vm2 = vcmp.eq.f32.partialorder %v252_v33, inf  ;;  %v261_v39 = vand.u32 2147483648, %v252_v33 }
 0x164   : > { %v254_v41 = vmul.f32 %v252_v33, %v252_v33  ;;  %vm260_vm3 = vcmp.eq.f32.partialorder %v252_v33, 0.0 }
 0x165   : > { %v253_v36 = vmax.f32 %v251_v35, 0.0 }
 0x167   : > { %463 = vrsqrt.f32 %v253_v36  ;;  %vm265_vm4 = vcmp.eq.f32.partialorder %v253_v36, inf  ;;  %v268_v50 = vand.u32 2147483648, %v253_v36  ;;  %v255_v52 = vmul.f32 %v253_v36, %v253_v36 }
 0x168   : > { %vm267_vm5 = vcmp.eq.f32.partialorder %v253_v36, 0.0 }
 0x170   : > { %v462_v37 = vpop.eup %461 }
 0x171   : > { %v257_v38 = vmul.f32 %v462_v37, %v252_v33 }
 0x173   : > { %v259_v42 = vsel %vm258_vm2, %v252_v33, %v257_v38 }
 0x174   : > { %v262_v43 = vsel %vm260_vm3, %v261_v39, %v259_v42  ;;  %v464_v45 = vpop.eup %463 }
 0x175   : > { %v270_v46 = vmul.f32 %v262_v43, %v254_v41  ;;  %v264_v48 = vmul.f32 %v464_v45, %v253_v36 }
 0x177   : > { %v272_v49 = vmul.f32 %v270_v46, %v244_v24  ;;  %v266_v53 = vsel %vm265_vm4, %v253_v36, %v264_v48 }
 0x178   : > { %v269_v54 = vsel %vm267_vm5, %v268_v50, %v266_v53 }
 0x179   : > { %v274_v56 = vsub.f32 0.0, %v272_v49  ;;  %v271_v57 = vmul.f32 %v269_v54, %v255_v52 }
 0x17b   : > { %v273_v58 = vmul.f32 %v271_v57, %v245_v29  ;;  %v285_v60 = vsel %vm283_vm6, %v274_v56, 0.0 }
 0x17c   : > { %v288_v62 = vsel %vm287_vm8, %v285_v60, 0.0 }
 0x17d   : > { %v275_v59 = vsub.f32 0.0, %v273_v58 }
 0x17f   : > { %v286_v61 = vsel %vm284_vm7, %v275_v59, 0.0 }
 0x180   : > { %v289_v63 = vsel %vm287_vm8, %v286_v61, 0.0 }
 0x181   : > { %v290_v0 = vadd.f32 %v289_v63, %v288_v62 }
 0x183   : > { %291 = vadd.xlane.f32.xlu0 %v290_v0 }
 0x20c   : > { %v292_v1 = vpop.xlane.xlu0 %291 }
 0x20d   : > { %v293_v2 = vrot.slane %v292_v1, 4 }
 0x20f   : > { %v294_v3 = vadd.f32 %v293_v2, %v292_v1 }
 0x211   : > { %v295_v4 = vrot.slane %v294_v3, 2 }
 0x213   : > { %v296_v5 = vadd.f32 %v295_v4, %v294_v3 }
 0x215   : > { %v297_v6 = vrot.slane %v296_v5, 1 }
 0x217   : > { %v298_v7 = vadd.f32 %v297_v6, %v296_v5 }
 0x219   : > { %405 = vpush %v298_v7 }
 0x24a   : > { %s406_s7 = spop %405 }
 0x24b   : > { %v303_v8 = vstv %s406_s7 }
 0x24c   : > { %v304_v9 = vsel %vm302_vm11, %v303_v8, 0.0 }
 0x24d   : > { %305 = vst [vmem:[%s177_s5] sm:$0xff] %v304_v9 }
 0x24e   : > { %478 = shalt.err (!%p475_p3)
}
 0x24f   : > { %s479_s24 = scalar_lea.hbm %s610_s16, 128  ;;  %s483_s27 = scalar_lea.hbm %s647_s2, 512 }
 0x250   : > { %p480_p4 = scmp.ne.s32.totalorder %s610_s16, %s479_s24  ;;  %p484_p9 = scmp.lt.s32.totalorder %s610_s16, %s647_s2 }
 0x251   : > { %p485_p10 = scmp.lt.s32.totalorder %s483_s27, %s479_s24 }
 0x252   : > { %p481_p7 = pnand %p480_p4, %p582_p5 }
 0x253   : > { %p486_p11 = por %p485_p10, %p484_p9 }
 0x254   : > { %p482_p8 = pneg %p481_p7 }
 0x256   : > { %p487_p12 = pnand %p486_p11, %p482_p8 }
 0x258   : > { %490 = shalt.err (!%p487_p12)
}
 0x259   : > { %407 = dma.vmem_to_hbm [thread:$0]  (%p582_p5), %s321_s6, 128, %s610_s16, %s307_s17  }
 0x25a PF: > { %p413_p13 = scmp.ge.s32.totalorder %s525_s12, 2  ;;  %s332_s30 = sand.u32 1, %s513_s9  }
 0x25b   : > { %s333_s3 = scalar_lea.sflag [#allocation3], %s332_s30 }
 0x25c   : > { %p410_p0 = pnand %p413_p13, %p586_p6 }
 0x25e   : > { %p411_p1 = pneg %p410_p0 }
 0x260   : > { %508 = dma.done.wait (%p411_p1), %s333_s3, 128  }
 0x261   : > { %510 = vsyncadd (%p411_p1), %s333_s3, 4294967168  ;;  %p12_p2 = scmp.ge.s32.totalorder %s569_s15, 6   ;;  %s650_s9 = smov %s517_s10 }
 0x262   : > { %s651_s10 = smov %s521_s11  ;;  %s652_s11 = smov %s580_s18 }
 0x263   : > { %s653_s12 = smov %s569_s15  ;;  %14 = sbr.rel (!%p12_p2) target bundleno = 3 (0x3), region = 66 }
 0x268   :  { %338 = vsyncpa [#allocation3], 1 }
 0x269   :  { %340 = vsyncpa [#allocation3 + $0x1], 1 }

</bundles_post_ra>
